<compile_context>
chip_gen: v5e
topology: v5e:2x2
jax: 0.10.0
libtpu: 0.0.40
codegen_flags: <defaults>
</compile_context>

<pallas_src>
import functools

import jax
import jax.numpy as jnp
from jax.experimental import pallas as pl
from jax.experimental.pallas import tpu as pltpu


def _round_up(x: int, m: int) -> int:
    return ((x + m - 1) // m) * m


def _mlp_kernel(x_ref, w1_ref, b1_ref, w2_ref, b2_ref, w3_ref, b3_ref, o_ref):
    """Feature-major Q-MLP: x_ref is (d_in, tile) with the batch on lanes."""
    # Layer 1: (H1, d_in) @ (d_in, T) -> (H1, T); f32 accumulation on the MXU.
    h1 = jnp.dot(w1_ref[...], x_ref[...], preferred_element_type=jnp.float32)
    h1 = jnp.maximum(h1 + b1_ref[...], 0.0).astype(w2_ref.dtype)

    # Layer 2: (H2, H1) @ (H1, T) -> (H2, T).
    h2 = jnp.dot(w2_ref[...], h1, preferred_element_type=jnp.float32)
    h2 = jnp.maximum(h2 + b2_ref[...], 0.0).astype(w3_ref.dtype)

    # Layer 3: (1, H2) @ (H2, T) -> (1, T).  Batch stays on the lane axis, so
    # the store is an unmasked lane-dense (1, tile) block.
    q = jnp.dot(w3_ref[...], h2, preferred_element_type=jnp.float32) + b3_ref[...]
    o_ref[...] = q.astype(o_ref.dtype)


@functools.partial(jax.jit, static_argnames=("batch_tile", "compute_dtype"))
def q_value_forward(observation, action, params, *,
                    batch_tile=2048, compute_dtype=jnp.bfloat16):
    """Pallas-backed forward for StateActionValueFunction. Returns (B, 1) f32."""
    if action.ndim == 1:
        action = action[:, None]

    B, d_obs = observation.shape
    d_act = action.shape[1]
    d_in = d_obs + d_act

    (w1, b1), (w2, b2), (w3, b3) = params
    # Feature-major compute (h = W @ x) wants exactly PyTorch's (out, in)
    # weight layout, so no transposes are needed — only dtype casts.
    w1c = jnp.asarray(w1).astype(compute_dtype)          # (H1, d_in)
    w2c = jnp.asarray(w2).astype(compute_dtype)          # (H2, H1)
    w3c = jnp.asarray(w3).astype(compute_dtype)          # (1, H2)
    H1 = w1c.shape[0]
    H2 = w2c.shape[0]

    b1c = jnp.asarray(b1)[:, None].astype(jnp.float32)   # (H1, 1)
    b2c = jnp.asarray(b2)[:, None].astype(jnp.float32)   # (H2, 1)
    b3c = jnp.asarray(b3)[:, None].astype(jnp.float32)   # (1, 1)

    # Tile sizing: lane-aligned multiple of 128.  Cap the tile so the grid has
    # >= 2 steps whenever B >= 256, so dimension_semantics=("parallel",) can
    # shard the batch across both TensorCores on v7x.
    tile_req = max(128, _round_up(batch_tile, 128))
    b128 = _round_up(max(B, 1), 128)
    if b128 >= 256:
        tile = min(tile_req, _round_up(pl.cdiv(b128, 2), 128))
    else:
        tile = 128
    b_pad = _round_up(B, tile)
    n_tiles = b_pad // tile

    # Pack obs+act into one stream (single layer-1 matmul, single input DMA
    # stream) and go feature-major: (d_in, B_pad), batch on the lane axis.
    # Padded rows produce garbage Q values that are sliced off at the end.
    x = jnp.concatenate([observation, action], axis=-1).astype(compute_dtype)
    if b_pad != B:
        x = jnp.pad(x, ((0, b_pad - B), (0, 0)))
    xt = x.T                                              # (d_in, b_pad)

    itemsize = jnp.dtype(compute_dtype).itemsize
    flops = 2 * b_pad * (d_in * H1 + H1 * H2 + H2)
    bytes_accessed = (
        d_in * b_pad * itemsize                     # packed activations
        + b_pad * 4                                 # f32 output row
        + (w1c.size + w2c.size + w3c.size) * itemsize
        + (H1 + H2 + 1) * 4                         # f32 biases
    )

    out = pl.pallas_call(
        _mlp_kernel,
        out_shape=jax.ShapeDtypeStruct((1, b_pad), jnp.float32),
        grid_spec=pltpu.PrefetchScalarGridSpec(
            num_scalar_prefetch=0,
            grid=(n_tiles,),
            in_specs=[
                pl.BlockSpec((d_in, tile), lambda i: (0, i)),   # x^T tile
                pl.BlockSpec((H1, d_in), lambda i: (0, 0)),     # W1
                pl.BlockSpec((H1, 1), lambda i: (0, 0)),        # b1
                pl.BlockSpec((H2, H1), lambda i: (0, 0)),       # W2
                pl.BlockSpec((H2, 1), lambda i: (0, 0)),        # b2
                pl.BlockSpec((1, H2), lambda i: (0, 0)),        # W3
                pl.BlockSpec((1, 1), lambda i: (0, 0)),         # b3
            ],
            out_specs=pl.BlockSpec((1, tile), lambda i: (0, i)),
        ),
        compiler_params=pltpu.CompilerParams(
            dimension_semantics=("parallel",),
        ),
        cost_estimate=pl.CostEstimate(
            flops=flops, bytes_accessed=bytes_accessed, transcendentals=0),
    )(xt, w1c, b1c, w2c, b2c, w3c, b3c)

    # Lane-dense (1, B_pad) result -> (B, 1) like the PyTorch module.
    return out[0, :B][:, None]


def init_params(key, obs_dim, action_dim, hidden_sizes):
    """Deterministic PyTorch-Linear-style init (uniform +/- 1/sqrt(fan_in))."""
    sizes = [obs_dim + action_dim, *hidden_sizes, 1]
    params = []
    for i in range(len(sizes) - 1):
        fan_in, fan_out = sizes[i], sizes[i + 1]
        key, kw, kb = jax.random.split(key, 3)
        bound = 1.0 / jnp.sqrt(fan_in)
        w = jax.random.uniform(kw, (fan_out, fan_in), jnp.float32, -bound, bound)
        b = jax.random.uniform(kb, (fan_out,), jnp.float32, -bound, bound)
        params.append((w, b))
    return params


def _reference_forward(observation, action, params):
    if action.ndim == 1:
        action = action[:, None]
    x = jnp.concatenate([observation, action], axis=-1).astype(jnp.float32)
    (w1, b1), (w2, b2), (w3, b3) = params
    h1 = jnp.maximum(x @ w1.T + b1, 0.0)
    h2 = jnp.maximum(h1 @ w2.T + b2, 0.0)
    return h2 @ w3.T + b3


if __name__ == "__main__":
    OBS_DIM, ACT_DIM = 12, 4
    HIDDEN = [32, 32]

    key = jax.random.PRNGKey(0)
    k_obs, k_act, k_params, k_obs2, k_act2 = jax.random.split(key, 5)
    params = init_params(k_params, OBS_DIM, ACT_DIM, HIDDEN)

    # Case 1: small batch, bf16 compute (default), loose tolerance.
    B1 = 8
    obs1 = jax.random.normal(k_obs, (B1, OBS_DIM), jnp.float32)
    act1 = jax.random.normal(k_act, (B1, ACT_DIM), jnp.float32)
    q1 = jax.block_until_ready(q_value_forward(obs1, act1, params))
    ref1 = _reference_forward(obs1, act1, params)
    assert q1.shape == (B1, 1)
    assert jnp.allclose(q1, ref1, atol=5e-2, rtol=5e-2)

    # Case 2: non-multiple batch, multi-tile grid, f32 compute, tight tolerance.
    B2 = 300
    obs2 = jax.random.normal(k_obs2, (B2, OBS_DIM), jnp.float32)
    act2 = jax.random.normal(k_act2, (B2, ACT_DIM), jnp.float32)
    q2 = jax.block_until_ready(
        q_value_forward(obs2, act2, params, batch_tile=128,
                        compute_dtype=jnp.float32))
    ref2 = _reference_forward(obs2, act2, params)
    assert q2.shape == (B2, 1)
    assert jnp.allclose(q2, ref2, atol=1e-4, rtol=1e-4)

    print("KERNEL_OK")
</pallas_src>

<mosaic_0001>
module attributes {stable_mosaic.version = 11 : i64} {
  func.func @_mlp_kernel(%arg0: i32, %arg1: memref<16x128xbf16, #tpu.memory_space<vmem>>, %arg2: memref<32x16xbf16, #tpu.memory_space<vmem>>, %arg3: memref<32x1xf32, #tpu.memory_space<vmem>>, %arg4: memref<32x32xbf16, #tpu.memory_space<vmem>>, %arg5: memref<32x1xf32, #tpu.memory_space<vmem>>, %arg6: memref<1x32xbf16, #tpu.memory_space<vmem>>, %arg7: memref<1x1xf32, #tpu.memory_space<vmem>>, %arg8: memref<1x128xf32, #tpu.memory_space<vmem>>) attributes {dimension_semantics = [#tpu.dimension_semantics<parallel>], iteration_bounds = array<i64: 1>, scalar_prefetch = 0 : i64, scratch_operands = 0 : i64, tpu.core_type = #tpu.core_type<tc>, window_params = [{transform_indices = @transform_0, window_bounds = array<i64: 16, 128>}, {pipeline_mode = #tpu.pipeline_mode<synchronous>, transform_indices = @transform_1, window_bounds = array<i64: 32, 16>}, {pipeline_mode = #tpu.pipeline_mode<synchronous>, transform_indices = @transform_2, window_bounds = array<i64: 32, 1>}, {pipeline_mode = #tpu.pipeline_mode<synchronous>, transform_indices = @transform_3, window_bounds = array<i64: 32, 32>}, {pipeline_mode = #tpu.pipeline_mode<synchronous>, transform_indices = @transform_4, window_bounds = array<i64: 32, 1>}, {pipeline_mode = #tpu.pipeline_mode<synchronous>, transform_indices = @transform_5, window_bounds = array<i64: 1, 32>}, {pipeline_mode = #tpu.pipeline_mode<synchronous>, transform_indices = @transform_6, window_bounds = array<i64: 1, 1>}, {transform_indices = @transform_7, window_bounds = array<i64: 1, 128>}]} {
    %c0 = arith.constant 0 : index
    %c0_0 = arith.constant 0 : index
    %0 = vector.load %arg2[%c0, %c0_0] : memref<32x16xbf16, #tpu.memory_space<vmem>>, vector<32x16xbf16>
    %c0_1 = arith.constant 0 : index
    %c0_2 = arith.constant 0 : index
    %1 = vector.load %arg1[%c0_1, %c0_2] : memref<16x128xbf16, #tpu.memory_space<vmem>>, vector<16x128xbf16>
    %cst = arith.constant dense<0.000000e+00> : vector<32x128xf32>
    %2 = tpu.matmul %0, %1, %cst {dimension_numbers = #tpu.dot_dimension_numbers<[1], [0], [0], [1], [0, 0, 1, 1], [], []>} : vector<32x16xbf16>, vector<16x128xbf16>, vector<32x128xf32> -> vector<32x128xf32>
    %c0_3 = arith.constant 0 : index
    %c0_4 = arith.constant 0 : index
    %3 = vector.load %arg3[%c0_3, %c0_4] : memref<32x1xf32, #tpu.memory_space<vmem>>, vector<32x1xf32>
    %4 = vector.broadcast %3 : vector<32x1xf32> to vector<32x128xf32>
    %5 = arith.addf %2, %4 : vector<32x128xf32>
    %cst_5 = arith.constant 0.000000e+00 : f32
    %6 = vector.broadcast %cst_5 : f32 to vector<32x128xf32>
    %7 = arith.maximumf %5, %6 : vector<32x128xf32>
    %8 = arith.truncf %7 : vector<32x128xf32> to vector<32x128xbf16>
    %c0_6 = arith.constant 0 : index
    %c0_7 = arith.constant 0 : index
    %9 = vector.load %arg4[%c0_6, %c0_7] : memref<32x32xbf16, #tpu.memory_space<vmem>>, vector<32x32xbf16>
    %cst_8 = arith.constant dense<0.000000e+00> : vector<32x128xf32>
    %10 = tpu.matmul %9, %8, %cst_8 {dimension_numbers = #tpu.dot_dimension_numbers<[1], [0], [0], [1], [0, 0, 1, 1], [], []>} : vector<32x32xbf16>, vector<32x128xbf16>, vector<32x128xf32> -> vector<32x128xf32>
    %c0_9 = arith.constant 0 : index
    %c0_10 = arith.constant 0 : index
    %11 = vector.load %arg5[%c0_9, %c0_10] : memref<32x1xf32, #tpu.memory_space<vmem>>, vector<32x1xf32>
    %12 = vector.broadcast %11 : vector<32x1xf32> to vector<32x128xf32>
    %13 = arith.addf %10, %12 : vector<32x128xf32>
    %cst_11 = arith.constant 0.000000e+00 : f32
    %14 = vector.broadcast %cst_11 : f32 to vector<32x128xf32>
    %15 = arith.maximumf %13, %14 : vector<32x128xf32>
    %16 = arith.truncf %15 : vector<32x128xf32> to vector<32x128xbf16>
    %c0_12 = arith.constant 0 : index
    %c0_13 = arith.constant 0 : index
    %17 = vector.load %arg6[%c0_12, %c0_13] : memref<1x32xbf16, #tpu.memory_space<vmem>>, vector<1x32xbf16>
    %cst_14 = arith.constant dense<0.000000e+00> : vector<1x128xf32>
    %18 = tpu.matmul %17, %16, %cst_14 {dimension_numbers = #tpu.dot_dimension_numbers<[1], [0], [0], [1], [0, 0, 1, 1], [], []>} : vector<1x32xbf16>, vector<32x128xbf16>, vector<1x128xf32> -> vector<1x128xf32>
    %c0_15 = arith.constant 0 : index
    %c0_16 = arith.constant 0 : index
    %19 = vector.load %arg7[%c0_15, %c0_16] : memref<1x1xf32, #tpu.memory_space<vmem>>, vector<1x1xf32>
    %20 = vector.broadcast %19 : vector<1x1xf32> to vector<1x128xf32>
    %21 = arith.addf %18, %20 : vector<1x128xf32>
    %c0_17 = arith.constant 0 : index
    %c0_18 = arith.constant 0 : index
    %22 = vector.load %arg8[%c0_17, %c0_18] : memref<1x128xf32, #tpu.memory_space<vmem>>, vector<1x128xf32>
    tpu.vector_store %arg8[%c0_17, %c0_18], %21 {strides = array<i32>} : memref<1x128xf32, #tpu.memory_space<vmem>>, vector<1x128xf32>,
    return
  }
  func.func @transform_0(%arg0: i32) -> (i32, i32) {
    %c0_i32 = arith.constant 0 : i32
    %c0_i32_0 = arith.constant 0 : i32
    return %c0_i32, %arg0 : i32, i32
  }
  func.func @transform_1(%arg0: i32) -> (i32, i32) {
    %c0_i32 = arith.constant 0 : i32
    %c0_i32_0 = arith.constant 0 : i32
    %c0_i32_1 = arith.constant 0 : i32
    return %c0_i32, %c0_i32_0 : i32, i32
  }
  func.func @transform_2(%arg0: i32) -> (i32, i32) {
    %c0_i32 = arith.constant 0 : i32
    %c0_i32_0 = arith.constant 0 : i32
    %c0_i32_1 = arith.constant 0 : i32
    return %c0_i32, %c0_i32_0 : i32, i32
  }
  func.func @transform_3(%arg0: i32) -> (i32, i32) {
    %c0_i32 = arith.constant 0 : i32
    %c0_i32_0 = arith.constant 0 : i32
    %c0_i32_1 = arith.constant 0 : i32
    return %c0_i32, %c0_i32_0 : i32, i32
  }
  func.func @transform_4(%arg0: i32) -> (i32, i32) {
    %c0_i32 = arith.constant 0 : i32
    %c0_i32_0 = arith.constant 0 : i32
    %c0_i32_1 = arith.constant 0 : i32
    return %c0_i32, %c0_i32_0 : i32, i32
  }
  func.func @transform_5(%arg0: i32) -> (i32, i32) {
    %c0_i32 = arith.constant 0 : i32
    %c0_i32_0 = arith.constant 0 : i32
    %c0_i32_1 = arith.constant 0 : i32
    return %c0_i32, %c0_i32_0 : i32, i32
  }
  func.func @transform_6(%arg0: i32) -> (i32, i32) {
    %c0_i32 = arith.constant 0 : i32
    %c0_i32_0 = arith.constant 0 : i32
    %c0_i32_1 = arith.constant 0 : i32
    return %c0_i32, %c0_i32_0 : i32, i32
  }
  func.func @transform_7(%arg0: i32) -> (i32, i32) {
    %c0_i32 = arith.constant 0 : i32
    %c0_i32_0 = arith.constant 0 : i32
    return %c0_i32, %arg0 : i32, i32
  }
}

</mosaic_0001>

<bundles_post_ra>
// kernel: q_value_forward.1
= control target key start
LH: loop header
LB: loop body
LE: loop exit
PB: predicated region body
PF: predicated region fallthrough
CT: control target
= control target key end

     0   :  { %v242_v1 = vmov 0   ;;  %vm75_vm0 = vcmask 130048   ;;  %vm145_vm1 = vcmask 261120   ;;  %s334_s0 = inlined_call_operand.vmem [shape: bf16[16,128], index: 0, kind: input, shape index: {}]   ;;  %s335_s1 = inlined_call_operand.vmem [shape: bf16[32,16], index: 1, kind: input, shape index: {}]   ;;  %s336_s2 = inlined_call_operand.vmem [shape: f32[32,1], index: 2, kind: input, shape index: {}]   ;;  %s337_s4 = inlined_call_operand.vmem [shape: f32[32,1], index: 4, kind: input, shape index: {}]   ;;  %s338_s6 = inlined_call_operand.<no memory space> [shape: f32[1,1], index: 6, kind: input, shape index: {}]   ;;  %s339_s3 = inlined_call_operand.vmem [shape: bf16[32,32], index: 3, kind: input, shape index: {}]   ;;  %s340_s5 = inlined_call_operand.vmem [shape: bf16[1,32], index: 5, kind: input, shape index: {}]   ;;  %s341_s7 = inlined_call_operand.vmem [shape: f32[1,128], index: 7, kind: output, shape index: {}]  }
   0x1   :  { %v233_v0 = vld [vmem:[%s334_s0] sm:$0xff]  ;;  %240 = vset.pattern.permute.xlu1 %v242_v1  ;;  %239 = vset.pattern.permute.xlu0 %v242_v1  ;;  %v37_v2 = vld [vmem:[%s336_s2 + $0x10] sm:$0xff]  ;;  %v38_v5 = vld [vmem:[%s336_s2 + $0x18] sm:$0xff]  ;;  %v12_v12 = vstv %s338_s6 }
   0x2   :  { %v231_v3 = vld [vmem:[%s335_s1] sm:$0xff]  ;;  %51 = vperm.xlu0 %239, %v37_v2   ;;  %241 = vset.pattern.permute.xlu2 %v242_v1  ;;  %v36_v6 = vld [vmem:[%s336_s2 + $0x8] sm:$0xff]  ;;  %v113_v11 = vld [vmem:[%s337_s4 + $0x10] sm:$0xff]  ;;  %13 = vst [vmem:[#allocation2] sm:$0x1] %v12_v12 }
   0x3   :  { %v35_v4 = vld [vmem:[%s336_s2] sm:$0xff]  ;;  %89 = vmatpush.bf16.msra.mxu0 %v233_v0  ;;  %v112_v8 = vld [vmem:[%s337_s4 + $0x8] sm:$0xff]  ;;  %127 = vperm.xlu2 %241, %v113_v11   ;;  %v114_v15 = vld [vmem:[%s337_s4 + $0x18] sm:$0xff] }
   0x4   :  { %41 = vperm.xlu1 %240, %v35_v4   ;;  %v111_v7 = vld [vmem:[%s337_s4] sm:$0xff]  ;;  %v232_v9 = vld [vmem:[%s335_s1 + $0x8] sm:$0xff] }
   0x5   :  { %v234_v32 = vld [vmem:[%s339_s3] sm:$0xff]  ;;  %v235_v33 = vld [vmem:[%s339_s3 + $0x8] sm:$0xff] }
   0x6   :  { %218 = vmatmul.msk.bf16.vlgmr.msra.gmra.mxu0 %vm75_vm0, %v231_v3  ;;  %v177_v52 = vld [vmem:[%s340_s5] sm:$0x1] }
   0x9   :  { %v178_v18 = vld [vmem:[#allocation2] sm:$0x1] }
   0xa   :  { %56 = vperm.xlu0 %239, %v38_v5  }
   0xb   :  { %132 = vperm.xlu2 %241, %v114_v15  }
   0xc   :  { %46 = vperm.xlu1 %240, %v36_v6  }
  0x12   :  { %117 = vperm.xlu0 %239, %v111_v7  }
  0x13   :  { %181 = vperm.xlu2 %241, %v178_v18  }
  0x14   :  { %122 = vperm.xlu1 %240, %v112_v8  }
  0x16   :  { %219 = vmatmul.msk.bf16.gmra.mxu0 %vm75_vm0, %v232_v9 }
  0x5d   :  { %v128_v35 = vpop.permute.xlu2 %127 }
  0x65   :  { %v133_v40 = vpop.permute.xlu2 %132 }
  0x6d   :  { %v182_v53 = vpop.permute.xlu2 %181 }
  0x6e   :  { %v184_v54 = vperm.slane %v182_v53, 0 }
  0x74   :  { %v52_v16 = vpop.permute.xlu0 %51 }
  0x76   :  { %v42_v14 = vpop.permute.xlu1 %41 }
  0x7c   :  { %v57_v21 = vpop.permute.xlu0 %56 }
  0x7e   :  { %v47_v19 = vpop.permute.xlu1 %46 }
  0x83   :  { %v91_v10 = vpop.f32.mrf.mxu0 }
  0x84   :  { %v92_v25 = vadd.f32 %v91_v10, %v42_v14  ;;  %v118_v44 = vpop.permute.xlu0 %117 }
  0x86   :  { %v101_v30 = vmax.f32 %v92_v25, 0.0  ;;  %v123_v38 = vpop.permute.xlu1 %122 }
  0x8b   :  { %v93_v13 = vpop.f32.mrf.mxu0 }
  0x8c   :  { %v94_v23 = vadd.f32 %v93_v13, %v47_v19 }
  0x8e   :  { %v102_v28 = vmax.f32 %v94_v23, 0.0 }
  0x90   :  { %v105_v31 = vpack.c.bf16 %v102_v28, %v101_v30 }
  0x93   :  { %v96_v17 = vpop.f32.mrf.mxu0 }
  0x94   :  { %v97_v20 = vadd.f32 %v96_v17, %v52_v16 }
  0x96   :  { %v103_v26 = vmax.f32 %v97_v20, 0.0 }
  0x9b   :  { %v98_v22 = vpop.f32.mrf.mxu0 }
  0x9c   :  { %v99_v24 = vadd.f32 %v98_v22, %v57_v21 }
  0x9e   :  { %v104_v27 = vmax.f32 %v99_v24, 0.0 }
  0xa0   :  { %v106_v29 = vpack.c.bf16 %v104_v27, %v103_v26 }
  0xa2   :  { %158 = vmatpush.bf16.msra.mxu1 %v106_v29  ;;  %236 = vmatpush.bf16.msra.mxu3 %v106_v29 }
  0xa6   :  { %159 = vmatpush.bf16.msra.mxu1 %v105_v31  ;;  %237 = vmatpush.bf16.msra.mxu3 %v105_v31 }
  0xa9   :  { %228 = vmatmul.msk.bf16.vlgmr.msra.gmra.mxu1 %vm145_vm1, %v234_v32  ;;  %229 = vmatmul.msk.bf16.vlgmr.msra.gmra.mxu3 %vm145_vm1, %v235_v33 }
 0x126   :  { %v161_v34 = vpop.f32.mrf.mxu1 }
 0x127   :  { %v162_v45 = vadd.f32 %v161_v34, %v118_v44 }
 0x129   :  { %v171_v50 = vmax.f32 %v162_v45, 0.0 }
 0x12c   :  { %v166_v36 = vpop.f32.mrf.mxu3 }
 0x12d   :  { %v167_v39 = vadd.f32 %v166_v36, %v128_v35 }
 0x12e   :  { %v163_v37 = vpop.f32.mrf.mxu1 }
 0x12f   :  { %v164_v42 = vadd.f32 %v163_v37, %v123_v38  ;;  %v173_v46 = vmax.f32 %v167_v39, 0.0 }
 0x131   :  { %v172_v48 = vmax.f32 %v164_v42, 0.0 }
 0x133   :  { %v175_v51 = vpack.c.bf16 %v172_v48, %v171_v50 }
 0x134   :  { %v168_v41 = vpop.f32.mrf.mxu3 }
 0x135   :  { %v169_v43 = vadd.f32 %v168_v41, %v133_v40 }
 0x137   :  { %v174_v47 = vmax.f32 %v169_v43, 0.0 }
 0x139   :  { %v176_v49 = vpack.c.bf16 %v174_v47, %v173_v46 }
 0x13b   :  { %194 = vmatpush.bf16.msra.mxu2 %v176_v49 }
 0x13f   :  { %195 = vmatpush.bf16.msra.mxu2 %v175_v51 }
 0x142   :  { %230 = vmatmul.msk.bf16.vlgmr.msra.gmra.mxu2 %vm145_vm1, %v177_v52 }
 0x1c5   :  { %v197_v55 = vpop.f32.mrf.mxu2 }
 0x1c6   :  { %v198_v56 = vadd.f32 %v197_v55, %v184_v54 }
 0x1c8   :  { %201 = vst [vmem:[%s341_s7] sm:$0x1] %v198_v56 }
 0x1cd   :  { %v199_v57 = vpop.f32.mrf.mxu2 }

</bundles_post_ra>
